<compile_context>
chip_gen: v7x
topology: tpu7x:2x2x1
jax: 0.10.0
libtpu: 0.0.40
codegen_flags: <defaults>
</compile_context>

<pallas_src>
import math
from functools import partial

import jax
import jax.numpy as jnp
from jax import lax
from jax.experimental import pallas as pl
from jax.experimental.pallas import tpu as pltpu


def _conv_hardtanh_kernel(b_ref, w_ref, xp_ref, o_ref, *, N, C, H, W, K, pad, HPA):
    # b_ref : SMEM [1] f32 bias
    # w_ref : VMEM [K*K, 128] f32 weight table; row kh*K+kw holds w[c,kh,kw]
    #         replicated over channel c's lane segment.
    # xp_ref: VMEM [N*HPA, 128] f32 zero-padded, channel-in-lanes input plane.
    # o_ref : VMEM [N, 1, H, W] output.
    NHPA, LANES = xp_ref.shape
    seg = LANES // C

    plane = xp_ref[...]                    # (N*HPA, 128): whole input, one load
    bias = b_ref[0]

    # K independent partial accumulators (one per kh) -> ILP for the 4 VALU slots.
    accs = [jnp.zeros((NHPA, LANES), jnp.float32) for _ in range(K)]

    for kw in range(K):
        # One lane roll per kw.  The >= pad zero gutters on both sides of every
        # channel segment reproduce the conv's left/right zero padding, and no valid
        # lane ever reads across a segment boundary (|shift| <= pad).
        sh = (pad - kw) % LANES
        shifted = plane if sh == 0 else pltpu.roll(plane, sh, axis=1)
        for kh in range(K):
            accs[kh] = accs[kh] + shifted * w_ref[kh * K + kw, :]

    # Apply the kh (row) offsets with sublane rolls (XLU); the >= pad zero rows at the
    # bottom of every image block make the circular wrap exact.
    tot = accs[pad]
    for kh in range(K):
        if kh == pad:
            continue
        tot = tot + pltpu.roll(accs[kh], (pad - kh) % NHPA, axis=0)

    # Fold the C channel segments along lanes (log2(C) roll+add steps).
    step = LANES // 2
    while step >= seg:
        tot = tot + pltpu.roll(tot, (LANES - step) % LANES, axis=1)
        step //= 2

    out = jnp.clip(tot + bias, -math.pi, math.pi)
    for n in range(N):
        o_ref[n, 0, :, :] = out[n * HPA:n * HPA + H, pad:pad + W].astype(o_ref.dtype)


def output_branch_forward(x, weight, bias):
    """x: [N, C, H, W]; weight: [1, C, K, K]; bias: [1]. Returns [N, 1, H, W]."""
    N, C, H, W = x.shape
    K = weight.shape[-1]
    assert weight.shape == (1, C, K, K) and bias.shape == (1,)
    assert K % 2 == 1
    pad = K // 2                                   # 'same' padding (K=5 -> pad=2)
    LANES = 128
    assert C > 0 and (C & (C - 1)) == 0 and LANES % C == 0
    seg = LANES // C
    assert W + 2 * pad <= seg, "channel lane segment too narrow for this W/K"
    HPA = ((H + pad + 7) // 8) * 8                 # per-image sublane block (>= H + pad)

    # --- Channel-in-lanes, batch-in-sublanes, zero-padded layout (built once by XLA).
    xl = jnp.pad(x.astype(jnp.float32),
                 ((0, 0), (0, 0), (0, HPA - H), (pad, seg - pad - W)))  # (N,C,HPA,seg)
    xl = jnp.transpose(xl, (0, 2, 1, 3)).reshape(N * HPA, C * seg)      # (N*HPA, 128)

    # --- Lane-broadcast weight table: row kh*K+kw, lanes [c*seg,(c+1)*seg) = w[c,kh,kw].
    wt = jnp.transpose(weight.reshape(C, K, K).astype(jnp.float32), (1, 2, 0))
    wt = jnp.repeat(wt.reshape(K * K, C), seg, axis=1)                  # (K*K, 128)

    b = bias.astype(jnp.float32)                                        # [1] -> SMEM

    kernel = partial(_conv_hardtanh_kernel,
                     N=N, C=C, H=H, W=W, K=K, pad=pad, HPA=HPA)

    out = pl.pallas_call(
        kernel,
        out_shape=jax.ShapeDtypeStruct((N, 1, H, W), jnp.float32),
        in_specs=[
            pl.BlockSpec(memory_space=pltpu.MemorySpace.SMEM),   # bias scalar
            pl.BlockSpec(memory_space=pltpu.MemorySpace.VMEM),   # weight table
            pl.BlockSpec(memory_space=pltpu.MemorySpace.VMEM),   # padded input plane
        ],
        out_specs=pl.BlockSpec(memory_space=pltpu.MemorySpace.VMEM),
        cost_estimate=pl.CostEstimate(
            flops=2 * N * H * W * C * K * K,
            transcendentals=0,
            bytes_accessed=4 * (N * HPA * LANES + K * K * LANES + N * H * W)),
    )(b, wt, xl)
    return out


def reference_forward(x, weight, bias):
    """Pure-JAX reference for correctness checking."""
    out = lax.conv_general_dilated(
        x.astype(jnp.float32),
        weight.astype(jnp.float32),
        window_strides=(1, 1),
        padding=((2, 2), (2, 2)),
        dimension_numbers=("NCHW", "OIHW", "NCHW"),
        precision=lax.Precision.HIGHEST,
    )
    out = out + bias.reshape(1, -1, 1, 1)
    return jnp.clip(out, -math.pi, math.pi)


if __name__ == "__main__":
    # Small shapes consistent with the module: batch=2, output_channel=4, 16x16 spatial.
    N, C, H, W = 2, 4, 16, 16
    key = jax.random.PRNGKey(0)
    kx, kw, kb = jax.random.split(key, 3)

    x = jax.random.normal(kx, (N, C, H, W), dtype=jnp.float32)

    # Deterministic parameter init (mimics Conv2d's uniform(-bound, bound) init).
    fan_in = C * 5 * 5
    bound = 1.0 / math.sqrt(fan_in)
    weight = jax.random.uniform(kw, (1, C, 5, 5), minval=-bound, maxval=bound,
                                dtype=jnp.float32)
    bias = jax.random.uniform(kb, (1,), minval=-bound, maxval=bound,
                              dtype=jnp.float32)

    out = output_branch_forward(x, weight, bias)
    out = jax.block_until_ready(out)

    ref = reference_forward(x, weight, bias)
    assert out.shape == (N, 1, H, W)
    assert jnp.allclose(out, ref, atol=1e-4, rtol=1e-4), "mismatch vs reference"

    print("KERNEL_OK")
</pallas_src>

<mosaic_0001>
module attributes {stable_mosaic.version = 11 : i64} {
  func.func @_conv_hardtanh_kernel(%arg0: memref<1xf32, #tpu.memory_space<smem>>, %arg1: memref<25x128xf32, #tpu.memory_space<vmem>>, %arg2: memref<48x128xf32, #tpu.memory_space<vmem>>, %arg3: memref<2x1x16x16xf32, #tpu.memory_space<vmem>>) attributes {dimension_semantics = [], scalar_prefetch = 0 : i64, scratch_operands = 0 : i64, tpu.core_type = #tpu.core_type<tc>} {
    %c0 = arith.constant 0 : index
    %c0_0 = arith.constant 0 : index
    %0 = vector.load %arg2[%c0, %c0_0] : memref<48x128xf32, #tpu.memory_space<vmem>>, vector<48x128xf32>
    %c0_1 = arith.constant 0 : index
    %1 = memref.load %arg0[%c0_1] : memref<1xf32, #tpu.memory_space<smem>>
    %cst = arith.constant 0.000000e+00 : f32
    %2 = vector.broadcast %cst : f32 to vector<48x128xf32>
    %cst_2 = arith.constant 0.000000e+00 : f32
    %3 = vector.broadcast %cst_2 : f32 to vector<48x128xf32>
    %cst_3 = arith.constant 0.000000e+00 : f32
    %4 = vector.broadcast %cst_3 : f32 to vector<48x128xf32>
    %cst_4 = arith.constant 0.000000e+00 : f32
    %5 = vector.broadcast %cst_4 : f32 to vector<48x128xf32>
    %cst_5 = arith.constant 0.000000e+00 : f32
    %6 = vector.broadcast %cst_5 : f32 to vector<48x128xf32>
    %c2_i32 = arith.constant 2 : i32
    %7 = tpu.dynamic_rotate %0 by %c2_i32 dim 1 : vector<48x128xf32>, i32 -> vector<48x128xf32>
    %c0_6 = arith.constant 0 : index
    %c0_7 = arith.constant 0 : index
    %8 = vector.load %arg1[%c0_6, %c0_7] : memref<25x128xf32, #tpu.memory_space<vmem>>, vector<1x128xf32>
    %9 = vector.shape_cast %8 : vector<1x128xf32> to vector<128xf32>
    %10 = vector.shape_cast %9 : vector<128xf32> to vector<1x128xf32>
    %11 = vector.broadcast %10 : vector<1x128xf32> to vector<48x128xf32>
    %12 = arith.mulf %7, %11 : vector<48x128xf32>
    %13 = arith.addf %2, %12 : vector<48x128xf32>
    %c5 = arith.constant 5 : index
    %c0_8 = arith.constant 0 : index
    %14 = vector.load %arg1[%c5, %c0_8] : memref<25x128xf32, #tpu.memory_space<vmem>>, vector<1x128xf32>
    %15 = vector.shape_cast %14 : vector<1x128xf32> to vector<128xf32>
    %16 = vector.shape_cast %15 : vector<128xf32> to vector<1x128xf32>
    %17 = vector.broadcast %16 : vector<1x128xf32> to vector<48x128xf32>
    %18 = arith.mulf %7, %17 : vector<48x128xf32>
    %19 = arith.addf %3, %18 : vector<48x128xf32>
    %c10 = arith.constant 10 : index
    %c0_9 = arith.constant 0 : index
    %20 = vector.load %arg1[%c10, %c0_9] : memref<25x128xf32, #tpu.memory_space<vmem>>, vector<1x128xf32>
    %21 = vector.shape_cast %20 : vector<1x128xf32> to vector<128xf32>
    %22 = vector.shape_cast %21 : vector<128xf32> to vector<1x128xf32>
    %23 = vector.broadcast %22 : vector<1x128xf32> to vector<48x128xf32>
    %24 = arith.mulf %7, %23 : vector<48x128xf32>
    %25 = arith.addf %4, %24 : vector<48x128xf32>
    %c15 = arith.constant 15 : index
    %c0_10 = arith.constant 0 : index
    %26 = vector.load %arg1[%c15, %c0_10] : memref<25x128xf32, #tpu.memory_space<vmem>>, vector<1x128xf32>
    %27 = vector.shape_cast %26 : vector<1x128xf32> to vector<128xf32>
    %28 = vector.shape_cast %27 : vector<128xf32> to vector<1x128xf32>
    %29 = vector.broadcast %28 : vector<1x128xf32> to vector<48x128xf32>
    %30 = arith.mulf %7, %29 : vector<48x128xf32>
    %31 = arith.addf %5, %30 : vector<48x128xf32>
    %c20 = arith.constant 20 : index
    %c0_11 = arith.constant 0 : index
    %32 = vector.load %arg1[%c20, %c0_11] : memref<25x128xf32, #tpu.memory_space<vmem>>, vector<1x128xf32>
    %33 = vector.shape_cast %32 : vector<1x128xf32> to vector<128xf32>
    %34 = vector.shape_cast %33 : vector<128xf32> to vector<1x128xf32>
    %35 = vector.broadcast %34 : vector<1x128xf32> to vector<48x128xf32>
    %36 = arith.mulf %7, %35 : vector<48x128xf32>
    %37 = arith.addf %6, %36 : vector<48x128xf32>
    %c1_i32 = arith.constant 1 : i32
    %38 = tpu.dynamic_rotate %0 by %c1_i32 dim 1 : vector<48x128xf32>, i32 -> vector<48x128xf32>
    %c1 = arith.constant 1 : index
    %c0_12 = arith.constant 0 : index
    %39 = vector.load %arg1[%c1, %c0_12] : memref<25x128xf32, #tpu.memory_space<vmem>>, vector<1x128xf32>
    %40 = vector.shape_cast %39 : vector<1x128xf32> to vector<128xf32>
    %41 = vector.shape_cast %40 : vector<128xf32> to vector<1x128xf32>
    %42 = vector.broadcast %41 : vector<1x128xf32> to vector<48x128xf32>
    %43 = arith.mulf %38, %42 : vector<48x128xf32>
    %44 = arith.addf %13, %43 : vector<48x128xf32>
    %c6 = arith.constant 6 : index
    %c0_13 = arith.constant 0 : index
    %45 = vector.load %arg1[%c6, %c0_13] : memref<25x128xf32, #tpu.memory_space<vmem>>, vector<1x128xf32>
    %46 = vector.shape_cast %45 : vector<1x128xf32> to vector<128xf32>
    %47 = vector.shape_cast %46 : vector<128xf32> to vector<1x128xf32>
    %48 = vector.broadcast %47 : vector<1x128xf32> to vector<48x128xf32>
    %49 = arith.mulf %38, %48 : vector<48x128xf32>
    %50 = arith.addf %19, %49 : vector<48x128xf32>
    %c11 = arith.constant 11 : index
    %c0_14 = arith.constant 0 : index
    %51 = vector.load %arg1[%c11, %c0_14] : memref<25x128xf32, #tpu.memory_space<vmem>>, vector<1x128xf32>
    %52 = vector.shape_cast %51 : vector<1x128xf32> to vector<128xf32>
    %53 = vector.shape_cast %52 : vector<128xf32> to vector<1x128xf32>
    %54 = vector.broadcast %53 : vector<1x128xf32> to vector<48x128xf32>
    %55 = arith.mulf %38, %54 : vector<48x128xf32>
    %56 = arith.addf %25, %55 : vector<48x128xf32>
    %c16 = arith.constant 16 : index
    %c0_15 = arith.constant 0 : index
    %57 = vector.load %arg1[%c16, %c0_15] : memref<25x128xf32, #tpu.memory_space<vmem>>, vector<1x128xf32>
    %58 = vector.shape_cast %57 : vector<1x128xf32> to vector<128xf32>
    %59 = vector.shape_cast %58 : vector<128xf32> to vector<1x128xf32>
    %60 = vector.broadcast %59 : vector<1x128xf32> to vector<48x128xf32>
    %61 = arith.mulf %38, %60 : vector<48x128xf32>
    %62 = arith.addf %31, %61 : vector<48x128xf32>
    %c21 = arith.constant 21 : index
    %c0_16 = arith.constant 0 : index
    %63 = vector.load %arg1[%c21, %c0_16] : memref<25x128xf32, #tpu.memory_space<vmem>>, vector<1x128xf32>
    %64 = vector.shape_cast %63 : vector<1x128xf32> to vector<128xf32>
    %65 = vector.shape_cast %64 : vector<128xf32> to vector<1x128xf32>
    %66 = vector.broadcast %65 : vector<1x128xf32> to vector<48x128xf32>
    %67 = arith.mulf %38, %66 : vector<48x128xf32>
    %68 = arith.addf %37, %67 : vector<48x128xf32>
    %c2 = arith.constant 2 : index
    %c0_17 = arith.constant 0 : index
    %69 = vector.load %arg1[%c2, %c0_17] : memref<25x128xf32, #tpu.memory_space<vmem>>, vector<1x128xf32>
    %70 = vector.shape_cast %69 : vector<1x128xf32> to vector<128xf32>
    %71 = vector.shape_cast %70 : vector<128xf32> to vector<1x128xf32>
    %72 = vector.broadcast %71 : vector<1x128xf32> to vector<48x128xf32>
    %73 = arith.mulf %0, %72 : vector<48x128xf32>
    %74 = arith.addf %44, %73 : vector<48x128xf32>
    %c7 = arith.constant 7 : index
    %c0_18 = arith.constant 0 : index
    %75 = vector.load %arg1[%c7, %c0_18] : memref<25x128xf32, #tpu.memory_space<vmem>>, vector<1x128xf32>
    %76 = vector.shape_cast %75 : vector<1x128xf32> to vector<128xf32>
    %77 = vector.shape_cast %76 : vector<128xf32> to vector<1x128xf32>
    %78 = vector.broadcast %77 : vector<1x128xf32> to vector<48x128xf32>
    %79 = arith.mulf %0, %78 : vector<48x128xf32>
    %80 = arith.addf %50, %79 : vector<48x128xf32>
    %c12 = arith.constant 12 : index
    %c0_19 = arith.constant 0 : index
    %81 = vector.load %arg1[%c12, %c0_19] : memref<25x128xf32, #tpu.memory_space<vmem>>, vector<1x128xf32>
    %82 = vector.shape_cast %81 : vector<1x128xf32> to vector<128xf32>
    %83 = vector.shape_cast %82 : vector<128xf32> to vector<1x128xf32>
    %84 = vector.broadcast %83 : vector<1x128xf32> to vector<48x128xf32>
    %85 = arith.mulf %0, %84 : vector<48x128xf32>
    %86 = arith.addf %56, %85 : vector<48x128xf32>
    %c17 = arith.constant 17 : index
    %c0_20 = arith.constant 0 : index
    %87 = vector.load %arg1[%c17, %c0_20] : memref<25x128xf32, #tpu.memory_space<vmem>>, vector<1x128xf32>
    %88 = vector.shape_cast %87 : vector<1x128xf32> to vector<128xf32>
    %89 = vector.shape_cast %88 : vector<128xf32> to vector<1x128xf32>
    %90 = vector.broadcast %89 : vector<1x128xf32> to vector<48x128xf32>
    %91 = arith.mulf %0, %90 : vector<48x128xf32>
    %92 = arith.addf %62, %91 : vector<48x128xf32>
    %c22 = arith.constant 22 : index
    %c0_21 = arith.constant 0 : index
    %93 = vector.load %arg1[%c22, %c0_21] : memref<25x128xf32, #tpu.memory_space<vmem>>, vector<1x128xf32>
    %94 = vector.shape_cast %93 : vector<1x128xf32> to vector<128xf32>
    %95 = vector.shape_cast %94 : vector<128xf32> to vector<1x128xf32>
    %96 = vector.broadcast %95 : vector<1x128xf32> to vector<48x128xf32>
    %97 = arith.mulf %0, %96 : vector<48x128xf32>
    %98 = arith.addf %68, %97 : vector<48x128xf32>
    %c127_i32 = arith.constant 127 : i32
    %99 = tpu.dynamic_rotate %0 by %c127_i32 dim 1 : vector<48x128xf32>, i32 -> vector<48x128xf32>
    %c3 = arith.constant 3 : index
    %c0_22 = arith.constant 0 : index
    %100 = vector.load %arg1[%c3, %c0_22] : memref<25x128xf32, #tpu.memory_space<vmem>>, vector<1x128xf32>
    %101 = vector.shape_cast %100 : vector<1x128xf32> to vector<128xf32>
    %102 = vector.shape_cast %101 : vector<128xf32> to vector<1x128xf32>
    %103 = vector.broadcast %102 : vector<1x128xf32> to vector<48x128xf32>
    %104 = arith.mulf %99, %103 : vector<48x128xf32>
    %105 = arith.addf %74, %104 : vector<48x128xf32>
    %c8 = arith.constant 8 : index
    %c0_23 = arith.constant 0 : index
    %106 = vector.load %arg1[%c8, %c0_23] : memref<25x128xf32, #tpu.memory_space<vmem>>, vector<1x128xf32>
    %107 = vector.shape_cast %106 : vector<1x128xf32> to vector<128xf32>
    %108 = vector.shape_cast %107 : vector<128xf32> to vector<1x128xf32>
    %109 = vector.broadcast %108 : vector<1x128xf32> to vector<48x128xf32>
    %110 = arith.mulf %99, %109 : vector<48x128xf32>
    %111 = arith.addf %80, %110 : vector<48x128xf32>
    %c13 = arith.constant 13 : index
    %c0_24 = arith.constant 0 : index
    %112 = vector.load %arg1[%c13, %c0_24] : memref<25x128xf32, #tpu.memory_space<vmem>>, vector<1x128xf32>
    %113 = vector.shape_cast %112 : vector<1x128xf32> to vector<128xf32>
    %114 = vector.shape_cast %113 : vector<128xf32> to vector<1x128xf32>
    %115 = vector.broadcast %114 : vector<1x128xf32> to vector<48x128xf32>
    %116 = arith.mulf %99, %115 : vector<48x128xf32>
    %117 = arith.addf %86, %116 : vector<48x128xf32>
    %c18 = arith.constant 18 : index
    %c0_25 = arith.constant 0 : index
    %118 = vector.load %arg1[%c18, %c0_25] : memref<25x128xf32, #tpu.memory_space<vmem>>, vector<1x128xf32>
    %119 = vector.shape_cast %118 : vector<1x128xf32> to vector<128xf32>
    %120 = vector.shape_cast %119 : vector<128xf32> to vector<1x128xf32>
    %121 = vector.broadcast %120 : vector<1x128xf32> to vector<48x128xf32>
    %122 = arith.mulf %99, %121 : vector<48x128xf32>
    %123 = arith.addf %92, %122 : vector<48x128xf32>
    %c23 = arith.constant 23 : index
    %c0_26 = arith.constant 0 : index
    %124 = vector.load %arg1[%c23, %c0_26] : memref<25x128xf32, #tpu.memory_space<vmem>>, vector<1x128xf32>
    %125 = vector.shape_cast %124 : vector<1x128xf32> to vector<128xf32>
    %126 = vector.shape_cast %125 : vector<128xf32> to vector<1x128xf32>
    %127 = vector.broadcast %126 : vector<1x128xf32> to vector<48x128xf32>
    %128 = arith.mulf %99, %127 : vector<48x128xf32>
    %129 = arith.addf %98, %128 : vector<48x128xf32>
    %c126_i32 = arith.constant 126 : i32
    %130 = tpu.dynamic_rotate %0 by %c126_i32 dim 1 : vector<48x128xf32>, i32 -> vector<48x128xf32>
    %c4 = arith.constant 4 : index
    %c0_27 = arith.constant 0 : index
    %131 = vector.load %arg1[%c4, %c0_27] : memref<25x128xf32, #tpu.memory_space<vmem>>, vector<1x128xf32>
    %132 = vector.shape_cast %131 : vector<1x128xf32> to vector<128xf32>
    %133 = vector.shape_cast %132 : vector<128xf32> to vector<1x128xf32>
    %134 = vector.broadcast %133 : vector<1x128xf32> to vector<48x128xf32>
    %135 = arith.mulf %130, %134 : vector<48x128xf32>
    %136 = arith.addf %105, %135 : vector<48x128xf32>
    %c9 = arith.constant 9 : index
    %c0_28 = arith.constant 0 : index
    %137 = vector.load %arg1[%c9, %c0_28] : memref<25x128xf32, #tpu.memory_space<vmem>>, vector<1x128xf32>
    %138 = vector.shape_cast %137 : vector<1x128xf32> to vector<128xf32>
    %139 = vector.shape_cast %138 : vector<128xf32> to vector<1x128xf32>
    %140 = vector.broadcast %139 : vector<1x128xf32> to vector<48x128xf32>
    %141 = arith.mulf %130, %140 : vector<48x128xf32>
    %142 = arith.addf %111, %141 : vector<48x128xf32>
    %c14 = arith.constant 14 : index
    %c0_29 = arith.constant 0 : index
    %143 = vector.load %arg1[%c14, %c0_29] : memref<25x128xf32, #tpu.memory_space<vmem>>, vector<1x128xf32>
    %144 = vector.shape_cast %143 : vector<1x128xf32> to vector<128xf32>
    %145 = vector.shape_cast %144 : vector<128xf32> to vector<1x128xf32>
    %146 = vector.broadcast %145 : vector<1x128xf32> to vector<48x128xf32>
    %147 = arith.mulf %130, %146 : vector<48x128xf32>
    %148 = arith.addf %117, %147 : vector<48x128xf32>
    %c19 = arith.constant 19 : index
    %c0_30 = arith.constant 0 : index
    %149 = vector.load %arg1[%c19, %c0_30] : memref<25x128xf32, #tpu.memory_space<vmem>>, vector<1x128xf32>
    %150 = vector.shape_cast %149 : vector<1x128xf32> to vector<128xf32>
    %151 = vector.shape_cast %150 : vector<128xf32> to vector<1x128xf32>
    %152 = vector.broadcast %151 : vector<1x128xf32> to vector<48x128xf32>
    %153 = arith.mulf %130, %152 : vector<48x128xf32>
    %154 = arith.addf %123, %153 : vector<48x128xf32>
    %c24 = arith.constant 24 : index
    %c0_31 = arith.constant 0 : index
    %155 = vector.load %arg1[%c24, %c0_31] : memref<25x128xf32, #tpu.memory_space<vmem>>, vector<1x128xf32>
    %156 = vector.shape_cast %155 : vector<1x128xf32> to vector<128xf32>
    %157 = vector.shape_cast %156 : vector<128xf32> to vector<1x128xf32>
    %158 = vector.broadcast %157 : vector<1x128xf32> to vector<48x128xf32>
    %159 = arith.mulf %130, %158 : vector<48x128xf32>
    %160 = arith.addf %129, %159 : vector<48x128xf32>
    %c2_i32_32 = arith.constant 2 : i32
    %161 = tpu.dynamic_rotate %136 by %c2_i32_32 dim 0 : vector<48x128xf32>, i32 -> vector<48x128xf32>
    %162 = arith.addf %148, %161 : vector<48x128xf32>
    %c1_i32_33 = arith.constant 1 : i32
    %163 = tpu.dynamic_rotate %142 by %c1_i32_33 dim 0 : vector<48x128xf32>, i32 -> vector<48x128xf32>
    %164 = arith.addf %162, %163 : vector<48x128xf32>
    %c47_i32 = arith.constant 47 : i32
    %165 = tpu.dynamic_rotate %154 by %c47_i32 dim 0 : vector<48x128xf32>, i32 -> vector<48x128xf32>
    %166 = arith.addf %164, %165 : vector<48x128xf32>
    %c46_i32 = arith.constant 46 : i32
    %167 = tpu.dynamic_rotate %160 by %c46_i32 dim 0 : vector<48x128xf32>, i32 -> vector<48x128xf32>
    %168 = arith.addf %166, %167 : vector<48x128xf32>
    %c64_i32 = arith.constant 64 : i32
    %169 = tpu.dynamic_rotate %168 by %c64_i32 dim 1 : vector<48x128xf32>, i32 -> vector<48x128xf32>
    %170 = arith.addf %168, %169 : vector<48x128xf32>
    %c96_i32 = arith.constant 96 : i32
    %171 = tpu.dynamic_rotate %170 by %c96_i32 dim 1 : vector<48x128xf32>, i32 -> vector<48x128xf32>
    %172 = arith.addf %170, %171 : vector<48x128xf32>
    %173 = vector.broadcast %1 : f32 to vector<48x128xf32>
    %174 = arith.addf %172, %173 : vector<48x128xf32>
    %cst_34 = arith.constant -3.14159274 : f32
    %cst_35 = arith.constant 3.14159274 : f32
    %175 = vector.broadcast %cst_34 : f32 to vector<48x128xf32>
    %176 = arith.maximumf %175, %174 : vector<48x128xf32>
    %177 = vector.broadcast %cst_35 : f32 to vector<48x128xf32>
    %178 = arith.minimumf %177, %176 : vector<48x128xf32>
    %179 = vector.extract_strided_slice %178 {offsets = [0, 2], sizes = [16, 16], strides = [1, 1]} : vector<48x128xf32> to vector<16x16xf32>
    %c0_36 = arith.constant 0 : index
    %c0_37 = arith.constant 0 : index
    %c0_38 = arith.constant 0 : index
    %c0_39 = arith.constant 0 : index
    %180 = vector.load %arg3[%c0_36, %c0_37, %c0_38, %c0_39] : memref<2x1x16x16xf32, #tpu.memory_space<vmem>>, vector<1x1x16x16xf32>
    %181 = vector.shape_cast %180 : vector<1x1x16x16xf32> to vector<16x16xf32>
    %182 = vector.shape_cast %179 : vector<16x16xf32> to vector<1x1x16x16xf32>
    tpu.vector_store %arg3[%c0_36, %c0_37, %c0_38, %c0_39], %182 {strides = array<i32>} : memref<2x1x16x16xf32, #tpu.memory_space<vmem>>, vector<1x1x16x16xf32>,
    %183 = vector.extract_strided_slice %178 {offsets = [24, 2], sizes = [16, 16], strides = [1, 1]} : vector<48x128xf32> to vector<16x16xf32>
    %c1_40 = arith.constant 1 : index
    %c0_41 = arith.constant 0 : index
    %c0_42 = arith.constant 0 : index
    %c0_43 = arith.constant 0 : index
    %184 = vector.load %arg3[%c1_40, %c0_41, %c0_42, %c0_43] : memref<2x1x16x16xf32, #tpu.memory_space<vmem>>, vector<1x1x16x16xf32>
    %185 = vector.shape_cast %184 : vector<1x1x16x16xf32> to vector<16x16xf32>
    %186 = vector.shape_cast %183 : vector<16x16xf32> to vector<1x1x16x16xf32>
    tpu.vector_store %arg3[%c1_40, %c0_41, %c0_42, %c0_43], %186 {strides = array<i32>} : memref<2x1x16x16xf32, #tpu.memory_space<vmem>>, vector<1x1x16x16xf32>,
    return
  }
}

</mosaic_0001>

<bundles_post_ra>
// kernel: tpu_custom_call.1
= control target key start
LH: loop header
LB: loop body
LE: loop exit
PB: predicated region body
PF: predicated region fallthrough
CT: control target
= control target key end

     0   :  { %9 = vsyncpa [#allocation4], 0  ;;  %s1334_s0 = inlined_call_operand.<no memory space> [shape: f32[1], index: 0, kind: input, shape index: {}]   ;;  %s1335_s1 = inlined_call_operand.hbm [shape: f32[25,128], index: 1, kind: input, shape index: {}]   ;;  %s1336_s2 = inlined_call_operand.hbm [shape: f32[48,128], index: 2, kind: input, shape index: {}]   ;;  %s1337_s3 = inlined_call_operand.hbm [shape: f32[2,1,16,16], index: 3, kind: output, shape index: {}]  }
   0x1   :  { %10 = vsyncpa [#allocation7], 0 }
   0x2   :  { %11 = vsyncpa [#allocation5], 0  ;;  %s755_s12 = smov [#allocation3]   ;;  %s683_s16 = scalar_lea.hbm %s1335_s1, 512 }
   0x3   :  { %s19_s13 = sshll.u32 %s755_s12, 4  ;;  %p684_p0 = scmp.ne.s32.totalorder %s1335_s1, %s683_s16  ;;  %s20_s13 = int_to_ptr.vmem [resolvable:$true] %s19_s13 }
   0x4   :  { %p687_p1 = scmp.lt.u32.totalorder %s683_s16, %s1335_s1 }
   0x6   :  { %p689_p2 = pnand %p687_p1, %p684_p0 }
   0x8   :  { %692 = shalt.err (!%p689_p2)
}
   0x9   :  { %s693_s21 = scalar_lea.vmem %s20_s13, 512  ;;  %p698_p4 = scmp.lt.s32.totalorder %s20_s13, %s20_s13 }
   0xa   :  { %p694_p3 = scmp.ne.s32.totalorder %s20_s13, %s693_s21  ;;  %p699_p5 = scmp.lt.s32.totalorder %s693_s21, %s693_s21 }
   0xc   :  { %p700_p6 = por %p699_p5, %p698_p4 }
   0xe   :  { %p701_p7 = pnand %p700_p6, %p694_p3 }
  0x10   :  { %704 = shalt.err (!%p701_p7)
}
  0x11   :  { %s756_s22 = smov 128   ;;  %s757_s23 = smov 8  }
  0x12   :  { %25 = dma.hbm_to_vmem [thread:$0]  %s1335_s1, 512, %s20_s13, [#allocation4], %s756_s22, %s756_s22, %s757_s23  }
  0x13   :  { %s758_s26 = smov [#allocation6]   ;;  %s705_s30 = scalar_lea.hbm %s1336_s2, 768 }
  0x14   :  { %s31_s27 = sshll.u32 %s758_s26, 4  ;;  %p706_p8 = scmp.ne.s32.totalorder %s1336_s2, %s705_s30  ;;  %s32_s27 = int_to_ptr.vmem [resolvable:$true] %s31_s27 }
  0x15   :  { %p709_p9 = scmp.lt.u32.totalorder %s705_s30, %s1336_s2 }
  0x17   :  { %p711_p10 = pnand %p709_p9, %p706_p8 }
  0x19   :  { %714 = shalt.err (!%p711_p10)
}
  0x1a   :  { %s715_s8 = scalar_lea.vmem %s32_s27, 768  ;;  %p720_p12 = scmp.lt.s32.totalorder %s32_s27, %s32_s27 }
  0x1b   :  { %p716_p11 = scmp.ne.s32.totalorder %s32_s27, %s715_s8  ;;  %p721_p13 = scmp.lt.s32.totalorder %s715_s8, %s715_s8 }
  0x1d   :  { %p722_p0 = por %p721_p13, %p720_p12 }
  0x1f   :  { %p723_p1 = pnand %p722_p0, %p716_p11 }
  0x21   :  { %726 = shalt.err (!%p723_p1)
}
  0x22   :  { %37 = dma.hbm_to_vmem [thread:$0]  %s1336_s2, 768, %s32_s27, [#allocation7], %s756_s22, %s756_s22, %s757_s23  }
  0x23   :  { %749 = dma.done.wait [#allocation4], 512  }
  0x24   :  { %750 = vsyncadd [#allocation4], 4294966784 }
  0x25   :  { %751 = dma.done.wait [#allocation7], 768  }
  0x26   :  { %752 = vsyncadd [#allocation7], 4294966528  ;;  %v816_v0 = vld [vmem:[#allocation6 + $0x10] sm:$0xff]  ;;  %v44_v1 = vld [vmem:[#allocation6] sm:$0xff]  ;;  %s759_s10 = smov 2   ;;  %s760_s2 = smov 1   ;;  %v510_v26 = vlaneseq }
  0x27   :  { %55 = vrot.lane.b32.xlu1 %v816_v0, %s759_s10  ;;  %51 = vrot.lane.b32.xlu0 %v44_v1, %s759_s10  ;;  %v47_v2 = vld [vmem:[#allocation6 + $0x18] sm:$0xff]  ;;  %v45_v3 = vld [vmem:[#allocation6 + $0x8] sm:$0xff]  ;;  %v819_v5 = vld [vmem:[#allocation6 + $0x20] sm:$0xff]  ;;  %s761_s11 = smov 127   ;;  %s762_s12 = smov 126   ;;  %vm611_vm4 = vcmask 130048  }
  0x28   :  { %v49_v4 = vld [vmem:[#allocation6 + $0x28] sm:$0xff]  ;;  %v653_v6 = vld [vmem:[#allocation3 + $0x2] ss:$0 sm:$0xff]  ;;  %v654_v7 = vld [vmem:[#allocation3 + $0x7] ss:$0 sm:$0xff]  ;;  %v899_v49 = vshrl.u32 %v510_v26, 7 }
  0x29   :  { %v655_v8 = vld [vmem:[#allocation3 + $0xc] ss:$0 sm:$0xff]  ;;  %v656_v9 = vld [vmem:[#allocation3 + $0x11] ss:$0 sm:$0xff]  ;;  %v657_v10 = vld [vmem:[#allocation3 + $0x16] ss:$0 sm:$0xff]  ;;  %v834_v11 = vmul.f32 %v653_v6, %v45_v3  ;;  %v836_v12 = vmul.f32 %v654_v7, %v45_v3  ;;  %v844_v16 = vmul.f32 %v653_v6, %v44_v1  ;;  %v846_v19 = vmul.f32 %v654_v7, %v44_v1 }
  0x2a   :  { %v838_v13 = vmul.f32 %v655_v8, %v45_v3  ;;  %v840_v14 = vmul.f32 %v656_v9, %v45_v3  ;;  %v842_v15 = vmul.f32 %v657_v10, %v45_v3  ;;  %v848_v20 = vmul.f32 %v655_v8, %v44_v1  ;;  %v643_v27 = vld [vmem:[#allocation3] ss:$0 sm:$0xff]  ;;  %v644_v32 = vld [vmem:[#allocation3 + $0x5] ss:$0 sm:$0xff]  ;;  %v646_v33 = vld [vmem:[#allocation3 + $0xf] ss:$0 sm:$0xff] }
  0x2b   :  { %57 = vrot.lane.b32.xlu1 %v47_v2, %s759_s10  ;;  %53 = vrot.lane.b32.xlu0 %v45_v3, %s759_s10  ;;  %v850_v21 = vmul.f32 %v656_v9, %v44_v1  ;;  %v852_v22 = vmul.f32 %v657_v10, %v44_v1  ;;  %v854_v23 = vmul.f32 %v653_v6, %v47_v2  ;;  %v647_v34 = vld [vmem:[#allocation3 + $0x14] ss:$0 sm:$0xff]  ;;  %v645_v39 = vld [vmem:[#allocation3 + $0xa] ss:$0 sm:$0xff]  ;;  %s763_s13 = smov 64   ;;  %s764_s14 = smov 96  }
  0x2c   :  { %v856_v24 = vmul.f32 %v654_v7, %v47_v2  ;;  %v858_v25 = vmul.f32 %v655_v8, %v47_v2  ;;  %v860_v28 = vmul.f32 %v656_v9, %v47_v2  ;;  %v862_v29 = vmul.f32 %v657_v10, %v47_v2  ;;  %1359 = vst [vmem:[#allocation32_spill] sm:$0xff] %v899_v49 }
  0x2d   :  { %1339 = vst [vmem:[#allocation12_spill] sm:$0xff] %v850_v21  ;;  %1340 = vst [vmem:[#allocation13_spill] sm:$0xff] %v852_v22  ;;  %v865_v30 = vmul.f32 %v653_v6, %v816_v0  ;;  %v868_v31 = vmul.f32 %v654_v7, %v816_v0  ;;  %v871_v35 = vmul.f32 %v656_v9, %v816_v0 }
  0x2e   :  { %1341 = vst [vmem:[#allocation14_spill] sm:$0xff] %v854_v23  ;;  %1342 = vst [vmem:[#allocation15_spill] sm:$0xff] %v856_v24  ;;  %v874_v36 = vmul.f32 %v657_v10, %v816_v0  ;;  %v876_v37 = vmul.f32 %v653_v6, %v49_v4  ;;  %v878_v38 = vmul.f32 %v654_v7, %v49_v4 }
  0x2f   :  { %61 = vrot.lane.b32.xlu1 %v49_v4, %s759_s10  ;;  %59 = vrot.lane.b32.xlu0 %v819_v5, %s759_s10  ;;  %1343 = vst [vmem:[#allocation16_spill] sm:$0xff] %v858_v25  ;;  %1344 = vst [vmem:[#allocation17_spill] sm:$0xff] %v860_v28  ;;  %v880_v42 = vmul.f32 %v656_v9, %v49_v4  ;;  %v882_v43 = vmul.f32 %v657_v10, %v49_v4 }
  0x30   :  { %1345 = vst [vmem:[#allocation18_spill] sm:$0xff] %v862_v29  ;;  %1346 = vst [vmem:[#allocation19_spill] sm:$0xff] %v865_v30  ;;  %v885_v44 = vmul.f32 %v653_v6, %v819_v5  ;;  %v888_v45 = vmul.f32 %v654_v7, %v819_v5  ;;  %v891_v46 = vmul.f32 %v655_v8, %v819_v5 }
  0x31   :  { %1347 = vst [vmem:[#allocation20_spill] sm:$0xff] %v868_v31  ;;  %1348 = vst [vmem:[#allocation21_spill] sm:$0xff] %v871_v35  ;;  %v894_v47 = vmul.f32 %v656_v9, %v819_v5  ;;  %v897_v48 = vmul.f32 %v657_v10, %v819_v5  ;;  %v909_v9 = vld [vmem:[#allocation3 + $0x6] ss:$0 sm:$0xff]  ;;  %v911_v10 = vld [vmem:[#allocation3 + $0xb] ss:$0 sm:$0xff] }
  0x32   :  { %1349 = vst [vmem:[#allocation22_spill] sm:$0xff] %v874_v36  ;;  %1350 = vst [vmem:[#allocation23_spill] sm:$0xff] %v876_v37 }
  0x33   :  { %146 = vrot.lane.b32.xlu1 %v45_v3, %s760_s2  ;;  %144 = vrot.lane.b32.xlu0 %v44_v1, %s760_s2  ;;  %1351 = vst [vmem:[#allocation24_spill] sm:$0xff] %v878_v38  ;;  %1352 = vst [vmem:[#allocation25_spill] sm:$0xff] %v880_v42 }
  0x34   :  { %1353 = vst [vmem:[#allocation26_spill] sm:$0xff] %v882_v43  ;;  %1354 = vst [vmem:[#allocation27_spill] sm:$0xff] %v885_v44 }
  0x35   :  { %1355 = vst [vmem:[#allocation28_spill] sm:$0xff] %v888_v45  ;;  %1356 = vst [vmem:[#allocation29_spill] sm:$0xff] %v891_v46 }
  0x36   :  { %1357 = vst [vmem:[#allocation30_spill] sm:$0xff] %v894_v47  ;;  %1358 = vst [vmem:[#allocation31_spill] sm:$0xff] %v897_v48  ;;  %v915_v47 = vld [vmem:[#allocation3 + $0x15] ss:$0 sm:$0xff] }
  0x37   :  { %150 = vrot.lane.b32.xlu1 %v47_v2, %s760_s2  ;;  %148 = vrot.lane.b32.xlu0 %v816_v0, %s760_s2 }
  0x3b   :  { %154 = vrot.lane.b32.xlu1 %v49_v4, %s760_s2  ;;  %152 = vrot.lane.b32.xlu0 %v819_v5, %s760_s2 }
  0x3f   :  { %320 = vrot.lane.b32.xlu1 %v45_v3, %s761_s11  ;;  %318 = vrot.lane.b32.xlu0 %v44_v1, %s761_s11 }
  0x43   :  { %324 = vrot.lane.b32.xlu1 %v47_v2, %s761_s11  ;;  %322 = vrot.lane.b32.xlu0 %v816_v0, %s761_s11 }
  0x47   :  { %328 = vrot.lane.b32.xlu1 %v49_v4, %s761_s11  ;;  %326 = vrot.lane.b32.xlu0 %v819_v5, %s761_s11 }
  0x4b   :  { %413 = vrot.lane.b32.xlu1 %v45_v3, %s762_s12  ;;  %411 = vrot.lane.b32.xlu0 %v44_v1, %s762_s12 }
  0x4f   :  { %417 = vrot.lane.b32.xlu1 %v47_v2, %s762_s12  ;;  %415 = vrot.lane.b32.xlu0 %v816_v0, %s762_s12 }
  0x53   :  { %421 = vrot.lane.b32.xlu1 %v49_v4, %s762_s12  ;;  %419 = vrot.lane.b32.xlu0 %v819_v5, %s762_s12  ;;  %v648_v4 = vld [vmem:[#allocation3 + $0x1] ss:$0 sm:$0xff] }
  0x99   :  { %v56_v17 = vpop.permute.xlu1 %55  ;;  %v52_v18 = vpop.permute.xlu0 %51 }
  0x9a   :  { %v901_v50 = vmul.f32 %v643_v27, %v56_v17  ;;  %v903_v51 = vmul.f32 %v644_v32, %v56_v17  ;;  %v905_v52 = vmul.f32 %v646_v33, %v56_v17  ;;  %v907_v53 = vmul.f32 %v647_v34, %v56_v17  ;;  %v913_v17 = vld [vmem:[#allocation3 + $0x10] ss:$0 sm:$0xff] }
  0x9b   :  { %v68_v54 = vmul.f32 %v643_v27, %v52_v18  ;;  %v85_v55 = vmul.f32 %v644_v32, %v52_v18  ;;  %v102_v56 = vmul.f32 %v645_v39, %v52_v18  ;;  %v115_v57 = vmul.f32 %v646_v33, %v52_v18 }
  0x9c   :  { %v132_v58 = vmul.f32 %v647_v34, %v52_v18 }
  0x9d   :  { %v58_v40 = vpop.permute.xlu1 %57  ;;  %v54_v41 = vpop.permute.xlu0 %53 }
  0x9e   :  { %v71_v59 = vmul.f32 %v643_v27, %v58_v40  ;;  %v88_v60 = vmul.f32 %v644_v32, %v58_v40  ;;  %v104_v61 = vmul.f32 %v645_v39, %v58_v40  ;;  %v118_v0 = vmul.f32 %v646_v33, %v58_v40 }
  0x9f   :  { %v135_v1 = vmul.f32 %v647_v34, %v58_v40  ;;  %v69_v2 = vmul.f32 %v643_v27, %v54_v41  ;;  %v86_v3 = vmul.f32 %v644_v32, %v54_v41  ;;  %v103_v5 = vmul.f32 %v645_v39, %v54_v41 }
  0xa0   :  { %v116_v6 = vmul.f32 %v646_v33, %v54_v41  ;;  %v133_v7 = vmul.f32 %v647_v34, %v54_v41 }
  0xa1   :  { %v62_v62 = vpop.permute.xlu1 %61  ;;  %v60_v63 = vpop.permute.xlu0 %59 }
  0xa2   :  { %v73_v8 = vmul.f32 %v643_v27, %v62_v62  ;;  %v90_v18 = vmul.f32 %v644_v32, %v62_v62  ;;  %v120_v26 = vmul.f32 %v646_v33, %v62_v62  ;;  %v137_v49 = vmul.f32 %v647_v34, %v62_v62 }
  0xa3   :  { %v72_v48 = vmul.f32 %v643_v27, %v60_v63  ;;  %v917_v40 = vmul.f32 %v644_v32, %v60_v63  ;;  %v919_v46 = vmul.f32 %v645_v39, %v60_v63  ;;  %v921_v45 = vmul.f32 %v646_v33, %v60_v63 }
  0xa4   :  { %v923_v41 = vmul.f32 %v647_v34, %v60_v63 }
  0xa5   :  { %v147_v44 = vpop.permute.xlu1 %146  ;;  %v145_v43 = vpop.permute.xlu0 %144 }
  0xa6   :  { %v162_v42 = vmul.f32 %v648_v4, %v147_v44  ;;  %v179_v38 = vmul.f32 %v909_v9, %v147_v44  ;;  %v196_v37 = vmul.f32 %v911_v10, %v147_v44  ;;  %v209_v62 = vmul.f32 %v913_v17, %v147_v44 }
  0xa7   :  { %v226_v27 = vmul.f32 %v915_v47, %v147_v44  ;;  %v161_v36 = vmul.f32 %v648_v4, %v145_v43  ;;  %v178_v32 = vmul.f32 %v909_v9, %v145_v43  ;;  %v195_v39 = vmul.f32 %v911_v10, %v145_v43 }
  0xa8   :  { %v168_v33 = vadd.f32 %v162_v42, %v69_v2  ;;  %v185_v35 = vadd.f32 %v179_v38, %v86_v3  ;;  %v200_v34 = vadd.f32 %v196_v37, %v103_v5  ;;  %v215_v63 = vadd.f32 %v209_v62, %v116_v6 }
  0xa9   :  { %v232_v31 = vadd.f32 %v226_v27, %v133_v7  ;;  %v931_v30 = vadd.f32 %v161_v36, %v68_v54  ;;  %v933_v29 = vadd.f32 %v178_v32, %v85_v55  ;;  %v935_v28 = vadd.f32 %v195_v39, %v102_v56  ;;  %v151_v25 = vpop.permute.xlu1 %150  ;;  %v149_v24 = vpop.permute.xlu0 %148 }
  0xaa   :  { %v208_v44 = vmul.f32 %v913_v17, %v145_v43  ;;  %v225_v23 = vmul.f32 %v915_v47, %v145_v43  ;;  %v164_v22 = vmul.f32 %v648_v4, %v151_v25  ;;  %v181_v21 = vmul.f32 %v909_v9, %v151_v25 }
  0xab   :  { %v197_v38 = vmul.f32 %v911_v10, %v151_v25  ;;  %v211_v37 = vmul.f32 %v913_v17, %v151_v25  ;;  %v228_v36 = vmul.f32 %v915_v47, %v151_v25  ;;  %v163_v42 = vmul.f32 %v648_v4, %v149_v24 }
  0xac   :  { %v214_v54 = vadd.f32 %v208_v44, %v115_v57  ;;  %v231_v55 = vadd.f32 %v225_v23, %v132_v58  ;;  %v943_v56 = vadd.f32 %v164_v22, %v71_v59  ;;  %v945_v2 = vadd.f32 %v181_v21, %v88_v60 }
  0xad   :  { %v947_v3 = vadd.f32 %v197_v38, %v104_v61  ;;  %v949_v5 = vadd.f32 %v211_v37, %v118_v0  ;;  %v951_v43 = vadd.f32 %v228_v36, %v135_v1  ;;  %v954_v6 = vadd.f32 %v163_v42, %v901_v50  ;;  %v155_v7 = vpop.permute.xlu1 %154  ;;  %v153_v62 = vpop.permute.xlu0 %152  ;;  %v985_v38 = vld [vmem:[#allocation3 + $0x3] ss:$0 sm:$0xff] }
  0xae   :  { %v180_v25 = vmul.f32 %v909_v9, %v149_v24  ;;  %v210_v57 = vmul.f32 %v913_v17, %v149_v24  ;;  %v227_v22 = vmul.f32 %v915_v47, %v149_v24  ;;  %v166_v23 = vmul.f32 %v648_v4, %v155_v7 }
  0xaf   :  { %v183_v21 = vmul.f32 %v909_v9, %v155_v7  ;;  %v213_v58 = vmul.f32 %v913_v17, %v155_v7  ;;  %v230_v59 = vmul.f32 %v915_v47, %v155_v7  ;;  %v165_v60 = vmul.f32 %v648_v4, %v153_v62 }
  0xb0   :  { %v963_v61 = vadd.f32 %v180_v25, %v903_v51  ;;  %v966_v50 = vadd.f32 %v210_v57, %v905_v52  ;;  %v969_v0 = vadd.f32 %v227_v22, %v907_v53  ;;  %v971_v1 = vadd.f32 %v166_v23, %v73_v8  ;;  %v987_v8 = vld [vmem:[#allocation3 + $0x8] ss:$0 sm:$0xff]  ;;  %v1360_v25 = vld [vmem:[#allocation12_spill] sm:$0xff] }
  0xb1   :  { %v973_v24 = vadd.f32 %v183_v21, %v90_v18  ;;  %v975_v27 = vadd.f32 %v213_v58, %v120_v26  ;;  %v977_v32 = vadd.f32 %v230_v59, %v137_v49  ;;  %v979_v39 = vadd.f32 %v165_v60, %v72_v48  ;;  %v321_v4 = vpop.permute.xlu1 %320  ;;  %v989_v18 = vld [vmem:[#allocation3 + $0xd] ss:$0 sm:$0xff]  ;;  %v991_v26 = vld [vmem:[#allocation3 + $0x12] ss:$0 sm:$0xff]  ;;  %v993_v49 = vld [vmem:[#allocation3 + $0x17] ss:$0 sm:$0xff] }
  0xb2   :  { %v182_v51 = vmul.f32 %v909_v9, %v153_v62  ;;  %v198_v44 = vmul.f32 %v911_v10, %v153_v62  ;;  %v212_v52 = vmul.f32 %v913_v17, %v153_v62  ;;  %v229_v53 = vmul.f32 %v915_v47, %v153_v62  ;;  %v1363_v58 = vld [vmem:[#allocation15_spill] sm:$0xff] }
  0xb3   :  { %v249_v48 = vadd.f32 %v834_v11, %v168_v33  ;;  %v266_v9 = vadd.f32 %v836_v12, %v185_v35  ;;  %v281_v10 = vadd.f32 %v838_v13, %v200_v34  ;;  %v296_v17 = vadd.f32 %v840_v14, %v215_v63 }
  0xb4   :  { %v1000_v47 = vadd.f32 %v182_v51, %v917_v40  ;;  %v1003_v37 = vadd.f32 %v198_v44, %v919_v46  ;;  %v1006_v36 = vadd.f32 %v212_v52, %v921_v45  ;;  %v1009_v42 = vadd.f32 %v229_v53, %v923_v41  ;;  %v319_v46 = vpop.permute.xlu0 %318  ;;  %v1365_v53 = vld [vmem:[#allocation17_spill] sm:$0xff] }
  0xb5   :  { %v313_v11 = vadd.f32 %v842_v15, %v232_v31  ;;  %v336_v12 = vmul.f32 %v985_v38, %v321_v4  ;;  %v353_v13 = vmul.f32 %v987_v8, %v321_v4  ;;  %v370_v14 = vmul.f32 %v989_v18, %v321_v4  ;;  %v325_v63 = vpop.permute.xlu1 %324 }
  0xb6   :  { %v383_v35 = vmul.f32 %v991_v26, %v321_v4  ;;  %v400_v40 = vmul.f32 %v993_v49, %v321_v4  ;;  %v248_v45 = vadd.f32 %v844_v16, %v931_v30  ;;  %v265_v41 = vadd.f32 %v846_v19, %v933_v29  ;;  %v1361_v16 = vld [vmem:[#allocation13_spill] sm:$0xff] }
  0xb7   :  { %v1021_v33 = vadd.f32 %v336_v12, %v249_v48  ;;  %v1023_v15 = vadd.f32 %v353_v13, %v266_v9  ;;  %v1025_v31 = vadd.f32 %v370_v14, %v281_v10  ;;  %v280_v34 = vadd.f32 %v848_v20, %v935_v28  ;;  %v1362_v20 = vld [vmem:[#allocation14_spill] sm:$0xff] }
  0xb8   :  { %v1029_v7 = vadd.f32 %v383_v35, %v296_v17  ;;  %v1031_v62 = vadd.f32 %v400_v40, %v313_v11  ;;  %v295_v57 = vadd.f32 %v1360_v25, %v214_v54  ;;  %v312_v30 = vadd.f32 %v1361_v16, %v231_v55  ;;  %v1364_v54 = vld [vmem:[#allocation16_spill] sm:$0xff]  ;;  %v323_v10 = vpop.permute.xlu0 %322  ;;  %v1367_v35 = vld [vmem:[#allocation19_spill] sm:$0xff] }
  0xb9   :  { %v335_v19 = vmul.f32 %v985_v38, %v319_v46  ;;  %v352_v29 = vmul.f32 %v987_v8, %v319_v46  ;;  %v369_v22 = vmul.f32 %v989_v18, %v319_v46  ;;  %v382_v23 = vmul.f32 %v991_v26, %v319_v46  ;;  %v329_v13 = vpop.permute.xlu1 %328  ;;  %v1368_v40 = vld [vmem:[#allocation20_spill] sm:$0xff] }
  0xba   :  { %v399_v21 = vmul.f32 %v993_v49, %v319_v46  ;;  %v251_v28 = vadd.f32 %v1362_v20, %v943_v56  ;;  %v268_v59 = vadd.f32 %v1363_v58, %v945_v2  ;;  %v282_v60 = vadd.f32 %v1364_v54, %v947_v3  ;;  %v1366_v56 = vld [vmem:[#allocation18_spill] sm:$0xff]  ;;  %v1369_v46 = vld [vmem:[#allocation21_spill] sm:$0xff] }
  0xbb   :  { %v1046_v55 = vadd.f32 %v335_v19, %v248_v45  ;;  %v1048_v4 = vadd.f32 %v352_v29, %v265_v41  ;;  %v1050_v51 = vadd.f32 %v369_v22, %v280_v34  ;;  %v1052_v44 = vadd.f32 %v382_v23, %v295_v57  ;;  %v1372_v22 = vld [vmem:[#allocation24_spill] sm:$0xff] }
  0xbc   :  { %v1054_v52 = vadd.f32 %v399_v21, %v312_v30  ;;  %v298_v48 = vadd.f32 %v1365_v53, %v949_v5  ;;  %v315_v9 = vadd.f32 %v1366_v56, %v951_v43  ;;  %v338_v2 = vmul.f32 %v985_v38, %v325_v63  ;;  %v1373_v21 = vld [vmem:[#allocation25_spill] sm:$0xff] }
  0xbd   :  { %v355_v3 = vmul.f32 %v987_v8, %v325_v63  ;;  %v371_v17 = vmul.f32 %v989_v18, %v325_v63  ;;  %v385_v11 = vmul.f32 %v991_v26, %v325_v63  ;;  %v402_v12 = vmul.f32 %v993_v49, %v325_v63  ;;  %v1370_v63 = vld [vmem:[#allocation22_spill] sm:$0xff]  ;;  %v414_v56 = vpop.permute.xlu1 %413 }
  0xbe   :  { %v1065_v14 = vadd.f32 %v338_v2, %v251_v28  ;;  %v250_v5 = vadd.f32 %v1367_v35, %v954_v6  ;;  %v267_v43 = vadd.f32 %v1368_v40, %v963_v61  ;;  %v297_v45 = vadd.f32 %v1369_v46, %v966_v50  ;;  %v1371_v50 = vld [vmem:[#allocation23_spill] sm:$0xff]  ;;  %v1378_v40 = vld [vmem:[#allocation30_spill] sm:$0xff] }
  0xbf   :  { %v1073_v41 = vadd.f32 %v355_v3, %v268_v59  ;;  %v1075_v34 = vadd.f32 %v371_v17, %v282_v60  ;;  %v1077_v25 = vadd.f32 %v385_v11, %v298_v48  ;;  %v1079_v57 = vadd.f32 %v402_v12, %v315_v9  ;;  %v1374_v59 = vld [vmem:[#allocation26_spill] sm:$0xff]  ;;  %v327_v60 = vpop.permute.xlu0 %326  ;;  %v1375_v9 = vld [vmem:[#allocation27_spill] sm:$0xff] }
  0xc0   :  { %v314_v16 = vadd.f32 %v1370_v63, %v969_v0  ;;  %v337_v30 = vmul.f32 %v985_v38, %v323_v10  ;;  %v354_v6 = vmul.f32 %v987_v8, %v323_v10  ;;  %v384_v61 = vmul.f32 %v991_v26, %v323_v10  ;;  %v1113_v11 = vld [vmem:[#allocation3 + $0x4] ss:$0 sm:$0xff] }
  0xc1   :  { %v401_v19 = vmul.f32 %v993_v49, %v323_v10  ;;  %v253_v29 = vadd.f32 %v1371_v50, %v971_v1  ;;  %v270_v23 = vadd.f32 %v1372_v22, %v973_v24  ;;  %v300_v20 = vadd.f32 %v1373_v21, %v975_v27  ;;  %v1376_v10 = vld [vmem:[#allocation28_spill] sm:$0xff] }
  0xc2   :  { %v1093_v28 = vadd.f32 %v337_v30, %v250_v5  ;;  %v1095_v0 = vadd.f32 %v354_v6, %v267_v43  ;;  %v1097_v58 = vadd.f32 %v384_v61, %v297_v45  ;;  %v317_v54 = vadd.f32 %v1374_v59, %v977_v32  ;;  %v1377_v32 = vld [vmem:[#allocation29_spill] sm:$0xff]  ;;  %v1123_v43 = vld [vmem:[#allocation3 + $0x9] ss:$0 sm:$0xff] }
  0xc3   :  { %v1101_v53 = vadd.f32 %v401_v19, %v314_v16  ;;  %v340_v1 = vmul.f32 %v985_v38, %v329_v13  ;;  %v357_v48 = vmul.f32 %v987_v8, %v329_v13  ;;  %v387_v24 = vmul.f32 %v991_v26, %v329_v13  ;;  %v1138_v61 = vld [vmem:[#allocation3 + $0x18] ss:$0 sm:$0xff] }
  0xc4   :  { %v404_v27 = vmul.f32 %v993_v49, %v329_v13  ;;  %v252_v2 = vadd.f32 %v1375_v9, %v979_v39  ;;  %v269_v3 = vadd.f32 %v1376_v10, %v1000_v47  ;;  %v283_v17 = vadd.f32 %v1377_v32, %v1003_v37  ;;  %v1125_v39 = vld [vmem:[#allocation3 + $0xe] ss:$0 sm:$0xff] }
  0xc5   :  { %v1115_v12 = vadd.f32 %v340_v1, %v253_v29  ;;  %v1117_v35 = vadd.f32 %v357_v48, %v270_v23  ;;  %v1119_v5 = vadd.f32 %v387_v24, %v300_v20  ;;  %v299_v13 = vadd.f32 %v1378_v40, %v1006_v36  ;;  %v1379_v47 = vld [vmem:[#allocation31_spill] sm:$0xff]  ;;  %v1136_v36 = vld [vmem:[#allocation3 + $0x13] ss:$0 sm:$0xff]  ;;  %v418_v23 = vpop.permute.xlu1 %417 }
  0xc6   :  { %v1127_v46 = vadd.f32 %v404_v27, %v317_v54  ;;  %v316_v37 = vadd.f32 %v1379_v47, %v1009_v42  ;;  %v339_v45 = vmul.f32 %v985_v38, %v327_v60  ;;  %v356_v63 = vmul.f32 %v987_v8, %v327_v60  ;;  %v412_v42 = vpop.permute.xlu0 %411 }
  0xc7   :  { %v372_v16 = vmul.f32 %v989_v18, %v327_v60  ;;  %v386_v30 = vmul.f32 %v991_v26, %v327_v60  ;;  %v403_v6 = vmul.f32 %v993_v49, %v327_v60  ;;  %v429_v19 = vmul.f32 %v1113_v11, %v414_v56 }
  0xc8   :  { %v1141_v50 = vadd.f32 %v339_v45, %v252_v2  ;;  %v1143_v29 = vadd.f32 %v356_v63, %v269_v3  ;;  %v446_v38 = vmul.f32 %v1123_v43, %v414_v56  ;;  %v463_v8 = vmul.f32 %v1125_v39, %v414_v56 }
  0xc9   :  { %v1147_v18 = vadd.f32 %v372_v16, %v283_v17  ;;  %v1149_v26 = vadd.f32 %v386_v30, %v299_v13  ;;  %v1151_v49 = vadd.f32 %v403_v6, %v316_v37  ;;  %v1154_v22 = vadd.f32 %v429_v19, %v1021_v33  ;;  %v422_v47 = vpop.permute.xlu1 %421  ;;  %v1380_v37 = vld [vmem:[#allocation32_spill] sm:$0xff] }
  0xca   :  { %v1157_v21 = vadd.f32 %v446_v38, %v1023_v15  ;;  %v1160_v20 = vadd.f32 %v463_v8, %v1025_v31  ;;  %v476_v59 = vmul.f32 %v1136_v36, %v414_v56  ;;  %v1164_v54 = vmul.f32 %v1138_v61, %v414_v56  ;;  %v416_v40 = vpop.permute.xlu0 %415 }
  0xcb   :  { %v505_v60 = vrot.slane %v1154_v22, 6  ;;  %v428_v1 = vmul.f32 %v1113_v11, %v412_v42  ;;  %v445_v48 = vmul.f32 %v1123_v43, %v412_v42  ;;  %v462_v33 = vmul.f32 %v1125_v39, %v412_v42 }
  0xcc   :  { %v1171_v24 = vadd.f32 %v476_v59, %v1029_v7  ;;  %v522_v15 = vrot.slane %v1157_v21, 7  ;;  %v475_v31 = vmul.f32 %v1136_v36, %v412_v42  ;;  %v1176_v27 = vmul.f32 %v1138_v61, %v412_v42 }
  0xcd   :  { %v1179_v56 = vadd.f32 %v428_v1, %v1046_v55  ;;  %v1182_v9 = vadd.f32 %v445_v48, %v1048_v4  ;;  %v1185_v2 = vadd.f32 %v462_v33, %v1050_v51  ;;  %v431_v10 = vmul.f32 %v1113_v11, %v418_v23 }
  0xce   :  { %v537_v7 = vrot.slane %v1171_v24, 1  ;;  %v1190_v3 = vadd.f32 %v475_v31, %v1052_v44  ;;  %v448_v32 = vmul.f32 %v1123_v43, %v418_v23  ;;  %v464_v17 = vmul.f32 %v1125_v39, %v418_v23 }
  0xcf   :  { %v504_v55 = vrot.slane %v1179_v56, 6  ;;  %v521_v4 = vrot.slane %v1182_v9, 7  ;;  %v1197_v13 = vadd.f32 %v431_v10, %v1065_v14  ;;  %v478_v51 = vmul.f32 %v1136_v36, %v418_v23  ;;  %v420_v56 = vpop.permute.xlu0 %419 }
  0xd0   :  { %vm512_vm0 = vcmp.lt.s32.totalorder %v1380_v37, 2  ;;  %vm527_vm1 = vcmp.lt.s32.totalorder %v1380_v37, 1  ;;  %v536_v44 = vrot.slane %v1190_v3, 1  ;;  %v1204_v45 = vadd.f32 %v448_v32, %v1073_v41 }
  0xd1   :  { %v1207_v63 = vadd.f32 %v464_v17, %v1075_v34  ;;  %v1210_v16 = vmul.f32 %v1138_v61, %v418_v23  ;;  %v1213_v14 = vadd.f32 %v478_v51, %v1077_v25  ;;  %v507_v30 = vrot.slane %v1197_v13, 6 }
  0xd2   :  { %v430_v6 = vmul.f32 %v1113_v11, %v416_v40  ;;  %v447_v19 = vmul.f32 %v1123_v43, %v416_v40  ;;  %v524_v38 = vrot.slane %v1204_v45, 7  ;;  %v477_v41 = vmul.f32 %v1136_v36, %v416_v40 }
  0xd3   :  { %v494_v8 = vmul.f32 %v1138_v61, %v416_v40  ;;  %v433_v34 = vmul.f32 %v1113_v11, %v422_v47  ;;  %vm542_vm2 = vcmp.lt.s32.totalorder %v1380_v37, 7  ;;  %v539_v42 = vrot.slane %v1213_v14, 1 }
  0xd4   :  { %v436_v25 = vadd.f32 %v430_v6, %v1093_v28  ;;  %v1226_v23 = vadd.f32 %v447_v19, %v1095_v0  ;;  %v450_v59 = vmul.f32 %v1123_v43, %v422_v47  ;;  %v483_v1 = vadd.f32 %v477_v41, %v1097_v58 }
  0xd5   :  { %v500_v48 = vadd.f32 %v494_v8, %v1101_v53  ;;  %v439_v33 = vadd.f32 %v433_v34, %v1115_v12  ;;  %v480_v31 = vmul.f32 %v1136_v36, %v422_v47  ;;  %v497_v28 = vmul.f32 %v1138_v61, %v422_v47 }
  0xd6   :  { %v506_v10 = vrot.slane %v436_v25, 6  ;;  %v523_v3 = vrot.slane %v1226_v23, 7  ;;  %v456_v32 = vadd.f32 %v450_v59, %v1117_v35  ;;  %vm557_vm3 = vcmp.lt.s32.totalorder %v1380_v37, 6 }
  0xd7   :  { %v538_v0 = vrot.slane %v483_v1, 1  ;;  %v553_v17 = vrot.slane %v500_v48, 2  ;;  %v486_v58 = vadd.f32 %v480_v31, %v1119_v5  ;;  %v509_v40 = vrot.slane %v439_v33, 6 }
  0xd8   :  { %v503_v53 = vadd.f32 %v497_v28, %v1127_v46  ;;  %v526_v12 = vrot.slane %v456_v32, 7  ;;  %v432_v51 = vmul.f32 %v1113_v11, %v420_v56  ;;  %v449_v6 = vmul.f32 %v1123_v43, %v420_v56 }
  0xd9   :  { %v541_v19 = vrot.slane %v486_v58, 1  ;;  %v465_v41 = vmul.f32 %v1125_v39, %v420_v56  ;;  %v479_v35 = vmul.f32 %v1136_v36, %v420_v56  ;;  %v496_v47 = vmul.f32 %v1138_v61, %v420_v56 }
  0xda   :  { %v556_v8 = vrot.slane %v503_v53, 2  ;;  %v438_v34 = vadd.f32 %v432_v51, %v1141_v50  ;;  %v455_v5 = vadd.f32 %v449_v6, %v1143_v29  ;;  %v499_v46 = vadd.f32 %v1164_v54, %v1031_v62 }
  0xdb   :  { %v469_v25 = vadd.f32 %v465_v41, %v1147_v18  ;;  %v485_v11 = vadd.f32 %v479_v35, %v1149_v26  ;;  %v515_v43 = vsel %vm512_vm0, %v504_v55, %v505_v60  ;;  %v530_v39 = vsel %vm527_vm1, %v521_v4, %v522_v15 }
  0xdc   :  { %v508_v36 = vrot.slane %v438_v34, 6  ;;  %v525_v61 = vrot.slane %v455_v5, 7  ;;  %v518_v62 = vadd.f32 %v515_v43, %v1160_v20  ;;  %v545_v50 = vsel %vm542_vm2, %v537_v7, %v538_v0 }
  0xdd   :  { %v540_v29 = vrot.slane %v485_v11, 1  ;;  %v552_v18 = vrot.slane %v499_v46, 2  ;;  %v498_v26 = vadd.f32 %v1176_v27, %v1054_v52  ;;  %v516_v22 = vsel %vm512_vm0, %v509_v40, %v504_v55 }
  0xde   :  { %v533_v21 = vadd.f32 %v530_v39, %v518_v62  ;;  %v517_v54 = vadd.f32 %v516_v22, %v1185_v2  ;;  %v531_v20 = vsel %vm527_vm1, %v526_v12, %v521_v4  ;;  %v546_v60 = vsel %vm542_vm2, %v536_v44, %v537_v7 }
  0xdf   :  { %v560_v15 = vsel %vm557_vm3, %v552_v18, %v553_v17  ;;  %v551_v52 = vrot.slane %v498_v26, 2  ;;  %v502_v27 = vadd.f32 %v496_v47, %v1151_v49  ;;  %v513_v2 = vsel %vm512_vm0, %v507_v30, %v508_v36 }
  0xe0   :  { %v548_v9 = vadd.f32 %v545_v50, %v533_v21  ;;  %v532_v55 = vadd.f32 %v531_v20, %v517_v54  ;;  %v520_v23 = vadd.f32 %v513_v2, %v469_v25  ;;  %v528_v24 = vsel %vm527_vm1, %v524_v38, %v525_v61 }
  0xe1   :  { %v561_v7 = vsel %vm557_vm3, %v551_v52, %v552_v18  ;;  %v543_v4 = vsel %vm542_vm2, %v540_v29, %v541_v19  ;;  %v555_v49 = vrot.slane %v502_v27, 2  ;;  %v501_v44 = vadd.f32 %v1210_v16, %v1079_v57 }
  0xe2   :  { %v563_v59 = vadd.f32 %v560_v15, %v548_v9  ;;  %v547_v1 = vadd.f32 %v546_v60, %v532_v55  ;;  %v535_v48 = vadd.f32 %v528_v24, %v520_v23  ;;  %v514_v33 = vsel %vm512_vm0, %v506_v10, %v507_v30 }
  0xe3   :  { %v558_v31 = vsel %vm557_vm3, %v555_v49, %v556_v8  ;;  %v519_v56 = vadd.f32 %v514_v33, %v1207_v63  ;;  %v529_v32 = vsel %vm527_vm1, %v523_v3, %v524_v38  ;;  %v544_v57 = vsel %vm542_vm2, %v539_v42, %v540_v29 }
  0xe4   :  { %568 = vrot.lane.b32.xlu1 %v563_v59, %s763_s13  ;;  %v562_v13 = vadd.f32 %v561_v7, %v547_v1  ;;  %v550_v16 = vadd.f32 %v543_v4, %v535_v48  ;;  %v554_v30 = vrot.slane %v501_v44, 2  ;;  %v590_v37 = vstv %s1334_s0  ;;  %s765_s0 = smov [#allocation8]  }
  0xe5   :  { %v534_v10 = vadd.f32 %v529_v32, %v519_v56  ;;  %s630_s17 = sshll.u32 %s765_s0, 4  ;;  %s631_s17 = int_to_ptr.vmem [resolvable:$true] %s630_s17 }
  0xe6   :  { %566 = vrot.lane.b32.xlu0 %v562_v13, %s763_s13  ;;  %v565_v28 = vadd.f32 %v558_v31, %v550_v16  ;;  %v559_v63 = vsel %vm557_vm3, %v554_v30, %v555_v49  ;;  %s727_s18 = scalar_lea.vmem %s631_s17, 512  ;;  %p732_p3 = scmp.lt.s32.totalorder %s631_s17, %s631_s17 }
  0xe7   :  { %v549_v45 = vadd.f32 %v544_v57, %v534_v10  ;;  %p728_p2 = scmp.ne.s32.totalorder %s631_s17, %s727_s18  ;;  %p733_p4 = scmp.lt.s32.totalorder %s727_s18, %s727_s18 }
  0xe8   :  { %572 = vrot.lane.b32.xlu1 %v565_v28, %s763_s13 }
  0xe9   :  { %v564_v0 = vadd.f32 %v559_v63, %v549_v45  ;;  %p734_p5 = por %p733_p4, %p732_p3 }
  0xeb   :  { %570 = vrot.lane.b32.xlu0 %v564_v0, %s763_s13  ;;  %p735_p6 = pnand %p734_p5, %p728_p2 }
 0x156   :  { %v569_v38 = vpop.permute.xlu1 %568 }
 0x157   :  { %v575_v14 = vadd.f32 %v569_v38, %v563_v59 }
 0x158   :  { %v567_v3 = vpop.permute.xlu0 %566 }
 0x159   :  { %580 = vrot.lane.b32.xlu1 %v575_v14, %s764_s14  ;;  %v574_v42 = vadd.f32 %v567_v3, %v562_v13 }
 0x15a   :  { %v573_v17 = vpop.permute.xlu1 %572 }
 0x15b   :  { %v577_v58 = vadd.f32 %v573_v17, %v565_v28  ;;  %578 = vrot.lane.b32.xlu0 %v574_v42, %s764_s14 }
 0x15d   :  { %584 = vrot.lane.b32.xlu1 %v577_v58, %s764_s14  ;;  %v571_v40 = vpop.permute.xlu0 %570 }
 0x15e   :  { %v576_v53 = vadd.f32 %v571_v40, %v564_v0 }
 0x160   :  { %582 = vrot.lane.b32.xlu0 %v576_v53, %s764_s14 }
 0x1cb   :  { %v581_v12 = vpop.permute.xlu1 %580 }
 0x1cc   :  { %v587_v51 = vadd.f32 %v581_v12, %v575_v14 }
 0x1cd   :  { %v579_v6 = vpop.permute.xlu0 %578 }
 0x1ce   :  { %v592_v19 = vadd.f32 %v590_v37, %v587_v51  ;;  %v586_v41 = vadd.f32 %v579_v6, %v574_v42 }
 0x1cf   :  { %v585_v35 = vpop.permute.xlu1 %584 }
 0x1d0   :  { %v669_v47 = vclamps-f32 %v592_v19, 3.1415927  ;;  %v591_v8 = vadd.f32 %v590_v37, %v586_v41  ;;  %v589_v34 = vadd.f32 %v585_v35, %v577_v58 }
 0x1d2   :  { %607 = vrot.lane.b32.xlu1 %v669_v47, %s762_s12  ;;  %v668_v5 = vclamps-f32 %v591_v8, 3.1415927  ;;  %v594_v46 = vadd.f32 %v590_v37, %v589_v34  ;;  %v583_v25 = vpop.permute.xlu0 %582 }
 0x1d3   :  { %v588_v11 = vadd.f32 %v583_v25, %v576_v53 }
 0x1d4   :  { %v671_v43 = vclamps-f32 %v594_v46, 3.1415927  ;;  %605 = vrot.lane.b32.xlu0 %v668_v5, %s762_s12 }
 0x1d5   :  { %v593_v39 = vadd.f32 %v590_v37, %v588_v11 }
 0x1d6   :  { %618 = vrot.lane.b32.xlu1 %v671_v43, %s762_s12 }
 0x1d7   :  { %v670_v36 = vclamps-f32 %v593_v39, 3.1415927 }
 0x1d9   :  { %616 = vrot.lane.b32.xlu0 %v670_v36, %s762_s12 }
 0x244   :  { %v608_v61 = vpop.permute.xlu1 %607 }
 0x245   :  { %613 = vst.msk [vmem:[#allocation8 + $0x8] sm:$0xff] %vm611_vm4, %v608_v61 }
 0x246   :  { %v606_v62 = vpop.permute.xlu0 %605 }
 0x247   :  { %612 = vst.msk [vmem:[#allocation8] sm:$0xff] %vm611_vm4, %v606_v62 }
 0x248   :  { %v619_v50 = vpop.permute.xlu1 %618 }
 0x249   :  { %624 = vst.msk [vmem:[#allocation8 + $0x18] sm:$0xff] %vm611_vm4, %v619_v50 }
 0x24b   :  { %v617_v29 = vpop.permute.xlu0 %616 }
 0x24c   :  { %623 = vst.msk [vmem:[#allocation8 + $0x10] sm:$0xff] %vm611_vm4, %v617_v29 }
 0x24d   :  { %738 = shalt.err (!%p735_p6)
}
 0x24e   :  { %s739_s21 = scalar_lea.hbm %s1337_s3, 512 }
 0x24f   :  { %p740_p7 = scmp.ne.s32.totalorder %s1337_s3, %s739_s21  ;;  %p743_p8 = scmp.lt.u32.totalorder %s739_s21, %s1337_s3 }
 0x251   :  { %p745_p9 = pnand %p743_p8, %p740_p7 }
 0x253   :  { %748 = shalt.err (!%p745_p9)
}
 0x254   :  { %636 = dma.vmem_to_hbm [thread:$0]  %s631_s17, 512, %s1337_s3, [#allocation5], %s756_s22, %s756_s22, %s757_s23  }
 0x255   :  { %753 = dma.done.wait [#allocation5], 512  }
 0x256   :  { %754 = vsyncadd [#allocation5], 4294966784 }
 0x257   :  { %640 = vsyncpa [#allocation4], 1 }
 0x258   :  { %641 = vsyncpa [#allocation7], 1 }
 0x259   :  { %642 = vsyncpa [#allocation5], 1 }

</bundles_post_ra>
